<compile_context>
chip_gen: v7x
topology: tpu7x:2x2x1
jax: 0.10.0
libtpu: 0.0.40
codegen_flags: <defaults>
</compile_context>

<pallas_src>
import jax
import jax.numpy as jnp
from jax import lax
from jax.experimental import pallas as pl
from jax.experimental.pallas import tpu as pltpu

LANE = 128


def _shift_with_zero_fill(x, s, width, lane_iota, use_roll):
    """out[..., t] = x[..., t - s] for 0 <= t - s < width, else 0 (static s)."""
    if s == 0:
        return x
    if abs(s) >= width:
        return jnp.zeros_like(x)
    if use_roll:
        rolled = pltpu.roll(x, s % width, axis=x.ndim - 1)
        if s > 0:
            return jnp.where(lane_iota >= s, rolled, 0.0)
        return jnp.where(lane_iota < width + s, rolled, 0.0)
    # Slice + zero concat fallback (small or non-128-multiple tile widths).
    lead = x.shape[:-1]
    if s > 0:
        z = jnp.zeros(lead + (s,), x.dtype)
        return jnp.concatenate([z, x[..., : width - s]], axis=-1)
    z = jnp.zeros(lead + (-s,), x.dtype)
    return jnp.concatenate([x[..., -s:], z], axis=-1)


def _make_kernel(*, tiled, L, K, TL, TLH, pad_l, pad_r, Bt, Cin, Cout,
                 mask_len, use_roll, vpu_pointwise, mxu_dtype):
    f32 = jnp.float32

    def body(xc_ref, xl_ref, xr_ref, dww_ref, dwb_ref, pww_ref, pwb_ref, out_ref):
        j = pl.program_id(1) if tiled else 0

        # Weight / bias loads + casts hoisted out of the tap loop.
        dww = dww_ref[...].astype(f32)            # (Cin, K)
        dwb = dwb_ref[...].astype(f32)            # (Cin, 1)
        pww = pww_ref[...]                        # (Cout, Cin)
        pwb = pwb_ref[...].astype(f32)            # (Cout, 1)

        lane = None
        if use_roll or mask_len:
            lane = lax.broadcasted_iota(jnp.int32, (1, 1, TL), 2)

        xc = xc_ref[...].astype(f32)              # (Bt, Cin, TL)
        if mask_len:
            # NaN-safe zeroing of lanes past the sequence end (the partial last tile can
            # read uninitialized VMEM; use where, never multiply-by-mask).
            xc = jnp.where(j * TL + lane < L, xc, 0.0)

        lane_h = None
        xl = xr = None
        if tiled and (pad_l > 0 or pad_r > 0):
            lane_h = lax.broadcasted_iota(jnp.int32, (1, 1, TLH), 2)
            if pad_l > 0:
                # Left halo: 128-lane block ending at the tile start (always in-bounds
                # data; only needs zeroing at the sequence start).
                xl = jnp.where(j > 0, xl_ref[...].astype(f32), 0.0)
            if pad_r > 0:
                # Right halo: 128-lane block starting at the tile end. Zero everything
                # at / past the true sequence end (also covers the clamped last block).
                xr = jnp.where((j + 1) * TL + lane_h < L,
                               xr_ref[...].astype(f32), 0.0)

        # Depthwise conv: K shifted MACs; rolls go to the XLU, accumulation stays f32.
        acc = None     # main-tile contribution                  (Bt, Cin, TL)
        acc_l = None   # left-halo contribution  (first TLH lanes)  (Bt, Cin, TLH)
        acc_r = None   # right-halo contribution (last TLH lanes)   (Bt, Cin, TLH)
        for k in range(K):
            s = pad_l - k
            wk = dww[None, :, k:k + 1]                               # (1, Cin, 1)
            tap = _shift_with_zero_fill(xc, s, TL, lane, use_roll)
            acc = tap * wk if acc is None else acc + tap * wk
            if tiled and s > 0:
                lv = _shift_with_zero_fill(xl, s - TLH, TLH, lane_h, use_roll)
                acc_l = lv * wk if acc_l is None else acc_l + lv * wk
            if tiled and s < 0:
                rv = _shift_with_zero_fill(xr, TLH + s, TLH, lane_h, use_roll)
                acc_r = rv * wk if acc_r is None else acc_r + rv * wk

        # Patch the halo contributions back in with 128-aligned concats only.
        if acc_l is not None or acc_r is not None:
            if TL == TLH:
                if acc_l is not None:
                    acc = acc + acc_l
                if acc_r is not None:
                    acc = acc + acc_r
            else:
                zpad = jnp.zeros((Bt, Cin, TL - TLH), f32)
                if acc_l is not None:
                    acc = acc + jnp.concatenate([acc_l, zpad], axis=-1)
                if acc_r is not None:
                    acc = acc + jnp.concatenate([zpad, acc_r], axis=-1)

        acc = acc + dwb[None, :, :]

        # Pointwise 1x1 conv.
        if vpu_pointwise:
            # Small channel counts: Cin broadcast-MACs on the VPU beat Bt tiny MXU
            # matmuls (an (8,4)@(4,TL) matmul uses <1% of the MXU).
            pwf = pww.astype(f32)
            out = None
            for ci in range(Cin):
                col = pwf[:, ci:ci + 1][None, :, :]                  # (1, Cout, 1)
                contrib = acc[:, ci:ci + 1, :] * col                 # (Bt, Cout, TL)
                out = contrib if out is None else out + contrib
            out_ref[...] = (out + pwb[None, :, :]).astype(out_ref.dtype)
        else:
            lhs = pww.astype(mxu_dtype)                              # (Cout, Cin)
            for b in range(Bt):
                rhs = acc[b].astype(mxu_dtype)                       # (Cin, TL)
                o = jnp.dot(lhs, rhs, preferred_element_type=jnp.float32)
                out_ref[b] = (o + pwb).astype(out_ref.dtype)

    if tiled:
        def kernel(xc_ref, xl_ref, xr_ref, dww_ref, dwb_ref, pww_ref, pwb_ref, out_ref):
            body(xc_ref, xl_ref, xr_ref, dww_ref, dwb_ref, pww_ref, pwb_ref, out_ref)
    else:
        def kernel(xc_ref, dww_ref, dwb_ref, pww_ref, pwb_ref, out_ref):
            body(xc_ref, None, None, dww_ref, dwb_ref, pww_ref, pwb_ref, out_ref)
    return kernel


def _vmem_limit_bytes():
    """Scoped VMEM limit: generous on v5e/v6e (128 MiB physical), safe on v7x (64 MiB)."""
    try:
        cap = int(pltpu.get_tpu_info().vmem_capacity_bytes)
    except Exception:
        cap = 64 << 20                      # assume the smallest (v7x per-TC) VMEM
    return int(max(32 << 20, min(cap * 3 // 4, 96 << 20)))


def _largest_divisor_leq(n, cap):
    cap = max(1, min(n, cap))
    for d in range(cap, 0, -1):
        if n % d == 0:
            return d
    return 1


def depthwise_separable_conv1d(x, dw_w, dw_b, pw_w, pw_b, *, tl_max=2048):
    """x: (N, Cin, L); dw_w: (Cin, K); dw_b: (Cin,); pw_w: (Cout, Cin); pw_b: (Cout,)."""
    N, Cin, L = x.shape
    K = dw_w.shape[-1]
    Cout = pw_w.shape[0]
    # PyTorch padding='same' (stride 1): left pad = (K-1)//2, the extra pad goes right.
    pad_l = (K - 1) // 2
    pad_r = (K - 1) - pad_l
    itemsize = jnp.dtype(x.dtype).itemsize

    # Fold batch items into one grid step when L is small (amortize ~0.35us/step).
    if L >= 512:
        Bt = 1
    else:
        Bt = _largest_divisor_leq(N, max(1, 512 // max(L, 1)))

    # Length tiling: biggest lane-aligned tile that keeps double-buffered blocks plus
    # in-kernel f32 temporaries inside a per-step VMEM budget.
    vmem_limit = _vmem_limit_bytes()
    block_budget = max(2 << 20, min(24 << 20, vmem_limit // 4))
    per_lane = Bt * (2 * itemsize * (Cin + Cout)        # double-buffered in/out blocks
                     + 4 * (4 * Cin + 2 * Cout))        # f32 temporaries (taps/acc/out)
    max_tl = max(LANE, (block_budget // max(per_lane, 1)) // LANE * LANE)
    TL = min(tl_max, max_tl, pl.cdiv(L, LANE) * LANE)
    TL = max(LANE, (TL // LANE) * LANE)

    tiled = L > TL
    if not tiled:
        TL = L                                          # single full-length tile
        # Keep >= 2 grid steps along the (parallel) batch axis when possible: v7x has
        # two TensorCores that are fed by sharding parallel grid axes.
        if N >= 2 and N // Bt < 2:
            Bt = _largest_divisor_leq(N, N // 2)
    NB = N // Bt
    T = pl.cdiv(L, TL) if tiled else 1
    TLH = LANE
    R = TL // TLH if tiled else 1
    Tb = pl.cdiv(L, TLH)
    mask_len = tiled and (L % TL != 0)
    use_roll = (TL % LANE == 0)
    vpu_pointwise = (Cin <= 16 and Cout <= 32)
    mxu_dtype = jnp.bfloat16 if x.dtype == jnp.bfloat16 else jnp.float32

    if tiled:
        assert pad_l < TLH and pad_r < TLH, "kernel_size too large for 128-lane halos"

    dwb2 = dw_b.reshape(Cin, 1)
    pwb2 = pw_b.reshape(Cout, 1)

    if tiled:
        grid = (NB, T)
        in_specs = [
            # current length tile
            pl.BlockSpec((Bt, Cin, TL), lambda b, j: (b, 0, j)),
            # left halo: 128-lane block ending at the tile start (clamped at left edge)
            pl.BlockSpec((Bt, Cin, TLH),
                         lambda b, j: (b, 0, jnp.maximum(j * R - 1, 0))),
            # right halo: 128-lane block starting at the tile end (clamped at right edge)
            pl.BlockSpec((Bt, Cin, TLH),
                         lambda b, j: (b, 0, jnp.minimum((j + 1) * R, Tb - 1))),
            pl.BlockSpec((Cin, K), lambda b, j: (0, 0)),
            pl.BlockSpec((Cin, 1), lambda b, j: (0, 0)),
            pl.BlockSpec((Cout, Cin), lambda b, j: (0, 0)),
            pl.BlockSpec((Cout, 1), lambda b, j: (0, 0)),
        ]
        out_specs = pl.BlockSpec((Bt, Cout, TL), lambda b, j: (b, 0, j))
        operands = (x, x, x, dw_w, dwb2, pw_w, pwb2)
        dim_sem = ("parallel", "parallel")
    else:
        grid = (NB,)
        in_specs = [
            pl.BlockSpec((Bt, Cin, TL), lambda b: (b, 0, 0)),
            pl.BlockSpec((Cin, K), lambda b: (0, 0)),
            pl.BlockSpec((Cin, 1), lambda b: (0, 0)),
            pl.BlockSpec((Cout, Cin), lambda b: (0, 0)),
            pl.BlockSpec((Cout, 1), lambda b: (0, 0)),
        ]
        out_specs = pl.BlockSpec((Bt, Cout, TL), lambda b: (b, 0, 0))
        operands = (x, dw_w, dwb2, pw_w, pwb2)
        dim_sem = ("parallel",)

    def _build(roll_flag):
        kernel = _make_kernel(tiled=tiled, L=L, K=K, TL=TL, TLH=TLH, pad_l=pad_l,
                              pad_r=pad_r, Bt=Bt, Cin=Cin, Cout=Cout,
                              mask_len=mask_len, use_roll=roll_flag,
                              vpu_pointwise=vpu_pointwise, mxu_dtype=mxu_dtype)
        return pl.pallas_call(
            kernel,
            out_shape=jax.ShapeDtypeStruct((N, Cout, L), x.dtype),
            grid_spec=pltpu.PrefetchScalarGridSpec(
                num_scalar_prefetch=0, grid=grid,
                in_specs=in_specs, out_specs=out_specs),
            compiler_params=pltpu.CompilerParams(
                dimension_semantics=dim_sem, vmem_limit_bytes=vmem_limit),
        )

    if use_roll:
        try:
            return _build(True)(*operands)
        except Exception:
            # Fall back to slice+concat lane shifts if the XLU roll path is not
            # supported in this execution environment.
            pass
    return _build(False)(*operands)


def _reference(x, dw_w, dw_b, pw_w, pw_b):
    """Pure-JAX reference matching PyTorch Conv1d(padding='same', groups=Cin) + 1x1 conv."""
    N, Cin, L = x.shape
    K = dw_w.shape[-1]
    Cout = pw_w.shape[0]
    pad_l = (K - 1) // 2
    pad_r = (K - 1) - pad_l
    y = lax.conv_general_dilated(
        x, dw_w.reshape(Cin, 1, K), window_strides=(1,), padding=[(pad_l, pad_r)],
        dimension_numbers=("NCH", "OIH", "NCH"), feature_group_count=Cin,
        precision=lax.Precision.HIGHEST) + dw_b.reshape(1, Cin, 1)
    out = lax.conv_general_dilated(
        y, pw_w.reshape(Cout, Cin, 1), window_strides=(1,), padding=[(0, 0)],
        dimension_numbers=("NCH", "OIH", "NCH"),
        precision=lax.Precision.HIGHEST) + pw_b.reshape(1, Cout, 1)
    return out


if __name__ == "__main__":
    key = jax.random.PRNGKey(0)

    def run_case(case_key, N, Cin, Cout, K, L, tl_max, atol, rtol):
        ks = jax.random.split(case_key, 5)
        x = jax.random.normal(ks[0], (N, Cin, L), dtype=jnp.float32)
        dw_w = jax.random.normal(ks[1], (Cin, K), dtype=jnp.float32) * 0.3   # (Cin,1,K) squeezed
        dw_b = jax.random.normal(ks[2], (Cin,), dtype=jnp.float32) * 0.1
        pw_w = jax.random.normal(ks[3], (Cout, Cin), dtype=jnp.float32) * 0.3  # (Cout,Cin,1) squeezed
        pw_b = jax.random.normal(ks[4], (Cout,), dtype=jnp.float32) * 0.1
        out = jax.block_until_ready(
            depthwise_separable_conv1d(x, dw_w, dw_b, pw_w, pw_b, tl_max=tl_max))
        ref = _reference(x, dw_w, dw_b, pw_w, pw_b)
        assert out.shape == (N, Cout, L)
        err = float(jnp.max(jnp.abs(out - ref)))
        assert jnp.allclose(out, ref, atol=atol, rtol=rtol), (
            f"mismatch vs reference (N={N}, Cin={Cin}, Cout={Cout}, K={K}, L={L}): "
            f"max_abs_err={err}")

    k1, k2, k3 = jax.random.split(key, 3)
    # 1) DepthwiseSeparableConv1d(4, 8, 3, padding='same') at small shapes:
    #    single-tile path (no halo inputs), VPU pointwise path.
    run_case(k1, N=2, Cin=4, Cout=8, K=3, L=16, tl_max=2048, atol=1e-5, rtol=1e-5)
    # 2) Tiled path: several length tiles, halos, partial last tile (L % TL != 0).
    run_case(k2, N=2, Cin=8, Cout=16, K=3, L=320, tl_max=128, atol=1e-5, rtol=1e-5)
    # 3) Tiled path with wider taps (K=5, 2-lane halos), batch folding (Bt=2),
    #    L an exact multiple of TL (clamped right-halo case), and the MXU pointwise path.
    run_case(k3, N=2, Cin=16, Cout=64, K=5, L=256, tl_max=128, atol=2e-2, rtol=2e-2)

    print("KERNEL_OK")
</pallas_src>

<mosaic_0001>
module attributes {stable_mosaic.version = 11 : i64} {
  func.func @kernel(%arg0: i32, %arg1: memref<1x4x16xf32, #tpu.memory_space<vmem>>, %arg2: memref<4x3xf32, #tpu.memory_space<vmem>>, %arg3: memref<4x1xf32, #tpu.memory_space<vmem>>, %arg4: memref<8x4xf32, #tpu.memory_space<vmem>>, %arg5: memref<8x1xf32, #tpu.memory_space<vmem>>, %arg6: memref<1x8x16xf32, #tpu.memory_space<vmem>>) attributes {dimension_semantics = [#tpu.dimension_semantics<parallel>], iteration_bounds = array<i64: 2>, scalar_prefetch = 0 : i64, scratch_operands = 0 : i64, tpu.core_type = #tpu.core_type<tc>, window_params = [{transform_indices = @transform_0, window_bounds = array<i64: 1, 4, 16>}, {pipeline_mode = #tpu.pipeline_mode<synchronous>, transform_indices = @transform_1, window_bounds = array<i64: 4, 3>}, {pipeline_mode = #tpu.pipeline_mode<synchronous>, transform_indices = @transform_2, window_bounds = array<i64: 4, 1>}, {pipeline_mode = #tpu.pipeline_mode<synchronous>, transform_indices = @transform_3, window_bounds = array<i64: 8, 4>}, {pipeline_mode = #tpu.pipeline_mode<synchronous>, transform_indices = @transform_4, window_bounds = array<i64: 8, 1>}, {transform_indices = @transform_5, window_bounds = array<i64: 1, 8, 16>}]} {
    %c0 = arith.constant 0 : index
    %c0_0 = arith.constant 0 : index
    %0 = vector.load %arg2[%c0, %c0_0] : memref<4x3xf32, #tpu.memory_space<vmem>>, vector<4x3xf32>
    %c0_1 = arith.constant 0 : index
    %c0_2 = arith.constant 0 : index
    %1 = vector.load %arg3[%c0_1, %c0_2] : memref<4x1xf32, #tpu.memory_space<vmem>>, vector<4x1xf32>
    %c0_3 = arith.constant 0 : index
    %c0_4 = arith.constant 0 : index
    %2 = vector.load %arg4[%c0_3, %c0_4] : memref<8x4xf32, #tpu.memory_space<vmem>>, vector<8x4xf32>
    %c0_5 = arith.constant 0 : index
    %c0_6 = arith.constant 0 : index
    %3 = vector.load %arg5[%c0_5, %c0_6] : memref<8x1xf32, #tpu.memory_space<vmem>>, vector<8x1xf32>
    %c0_7 = arith.constant 0 : index
    %c0_8 = arith.constant 0 : index
    %c0_9 = arith.constant 0 : index
    %4 = vector.load %arg1[%c0_7, %c0_8, %c0_9] : memref<1x4x16xf32, #tpu.memory_space<vmem>>, vector<1x4x16xf32>
    %5 = vector.extract_strided_slice %0 {offsets = [0, 0], sizes = [4, 1], strides = [1, 1]} : vector<4x3xf32> to vector<4x1xf32>
    %6 = vector.shape_cast %5 : vector<4x1xf32> to vector<1x4x1xf32>
    %cst = arith.constant 0.000000e+00 : f32
    %7 = vector.broadcast %cst : f32 to vector<1x4x1xf32>
    %8 = vector.extract_strided_slice %4 {offsets = [0, 0, 0], sizes = [1, 4, 15], strides = [1, 1, 1]} : vector<1x4x16xf32> to vector<1x4x15xf32>
    %9 = tpu.concatenate %7, %8 in 2 : vector<1x4x1xf32>, vector<1x4x15xf32> -> vector<1x4x16xf32>
    %10 = vector.broadcast %6 : vector<1x4x1xf32> to vector<1x4x16xf32>
    %11 = arith.mulf %9, %10 : vector<1x4x16xf32>
    %12 = vector.extract_strided_slice %0 {offsets = [0, 1], sizes = [4, 1], strides = [1, 1]} : vector<4x3xf32> to vector<4x1xf32>
    %13 = vector.shape_cast %12 : vector<4x1xf32> to vector<1x4x1xf32>
    %14 = vector.broadcast %13 : vector<1x4x1xf32> to vector<1x4x16xf32>
    %15 = arith.mulf %4, %14 : vector<1x4x16xf32>
    %16 = arith.addf %11, %15 : vector<1x4x16xf32>
    %17 = vector.extract_strided_slice %0 {offsets = [0, 2], sizes = [4, 1], strides = [1, 1]} : vector<4x3xf32> to vector<4x1xf32>
    %18 = vector.shape_cast %17 : vector<4x1xf32> to vector<1x4x1xf32>
    %cst_10 = arith.constant 0.000000e+00 : f32
    %19 = vector.broadcast %cst_10 : f32 to vector<1x4x1xf32>
    %20 = vector.extract_strided_slice %4 {offsets = [0, 0, 1], sizes = [1, 4, 15], strides = [1, 1, 1]} : vector<1x4x16xf32> to vector<1x4x15xf32>
    %21 = tpu.concatenate %20, %19 in 2 : vector<1x4x15xf32>, vector<1x4x1xf32> -> vector<1x4x16xf32>
    %22 = vector.broadcast %18 : vector<1x4x1xf32> to vector<1x4x16xf32>
    %23 = arith.mulf %21, %22 : vector<1x4x16xf32>
    %24 = arith.addf %16, %23 : vector<1x4x16xf32>
    %25 = vector.shape_cast %1 : vector<4x1xf32> to vector<1x4x1xf32>
    %26 = vector.broadcast %25 : vector<1x4x1xf32> to vector<1x4x16xf32>
    %27 = arith.addf %24, %26 : vector<1x4x16xf32>
    %28 = vector.extract_strided_slice %2 {offsets = [0, 0], sizes = [8, 1], strides = [1, 1]} : vector<8x4xf32> to vector<8x1xf32>
    %29 = vector.shape_cast %28 : vector<8x1xf32> to vector<1x8x1xf32>
    %30 = vector.extract_strided_slice %27 {offsets = [0, 0, 0], sizes = [1, 1, 16], strides = [1, 1, 1]} : vector<1x4x16xf32> to vector<1x1x16xf32>
    %31 = vector.broadcast %30 : vector<1x1x16xf32> to vector<1x8x16xf32>
    %32 = vector.broadcast %29 : vector<1x8x1xf32> to vector<1x8x16xf32>
    %33 = arith.mulf %31, %32 : vector<1x8x16xf32>
    %34 = vector.extract_strided_slice %2 {offsets = [0, 1], sizes = [8, 1], strides = [1, 1]} : vector<8x4xf32> to vector<8x1xf32>
    %35 = vector.shape_cast %34 : vector<8x1xf32> to vector<1x8x1xf32>
    %36 = vector.extract_strided_slice %27 {offsets = [0, 1, 0], sizes = [1, 1, 16], strides = [1, 1, 1]} : vector<1x4x16xf32> to vector<1x1x16xf32>
    %37 = vector.broadcast %36 : vector<1x1x16xf32> to vector<1x8x16xf32>
    %38 = vector.broadcast %35 : vector<1x8x1xf32> to vector<1x8x16xf32>
    %39 = arith.mulf %37, %38 : vector<1x8x16xf32>
    %40 = arith.addf %33, %39 : vector<1x8x16xf32>
    %41 = vector.extract_strided_slice %2 {offsets = [0, 2], sizes = [8, 1], strides = [1, 1]} : vector<8x4xf32> to vector<8x1xf32>
    %42 = vector.shape_cast %41 : vector<8x1xf32> to vector<1x8x1xf32>
    %43 = vector.extract_strided_slice %27 {offsets = [0, 2, 0], sizes = [1, 1, 16], strides = [1, 1, 1]} : vector<1x4x16xf32> to vector<1x1x16xf32>
    %44 = vector.broadcast %43 : vector<1x1x16xf32> to vector<1x8x16xf32>
    %45 = vector.broadcast %42 : vector<1x8x1xf32> to vector<1x8x16xf32>
    %46 = arith.mulf %44, %45 : vector<1x8x16xf32>
    %47 = arith.addf %40, %46 : vector<1x8x16xf32>
    %48 = vector.extract_strided_slice %2 {offsets = [0, 3], sizes = [8, 1], strides = [1, 1]} : vector<8x4xf32> to vector<8x1xf32>
    %49 = vector.shape_cast %48 : vector<8x1xf32> to vector<1x8x1xf32>
    %50 = vector.extract_strided_slice %27 {offsets = [0, 3, 0], sizes = [1, 1, 16], strides = [1, 1, 1]} : vector<1x4x16xf32> to vector<1x1x16xf32>
    %51 = vector.broadcast %50 : vector<1x1x16xf32> to vector<1x8x16xf32>
    %52 = vector.broadcast %49 : vector<1x8x1xf32> to vector<1x8x16xf32>
    %53 = arith.mulf %51, %52 : vector<1x8x16xf32>
    %54 = arith.addf %47, %53 : vector<1x8x16xf32>
    %55 = vector.shape_cast %3 : vector<8x1xf32> to vector<1x8x1xf32>
    %56 = vector.broadcast %55 : vector<1x8x1xf32> to vector<1x8x16xf32>
    %57 = arith.addf %54, %56 : vector<1x8x16xf32>
    %c0_11 = arith.constant 0 : index
    %c0_12 = arith.constant 0 : index
    %c0_13 = arith.constant 0 : index
    %58 = vector.load %arg6[%c0_11, %c0_12, %c0_13] : memref<1x8x16xf32, #tpu.memory_space<vmem>>, vector<1x8x16xf32>
    tpu.vector_store %arg6[%c0_11, %c0_12, %c0_13], %57 {strides = array<i32>} : memref<1x8x16xf32, #tpu.memory_space<vmem>>, vector<1x8x16xf32>,
    return
  }
  func.func @transform_0(%arg0: i32) -> (i32, i32, i32) {
    %c0_i32 = arith.constant 0 : i32
    %c0_i32_0 = arith.constant 0 : i32
    %c0_i32_1 = arith.constant 0 : i32
    return %arg0, %c0_i32, %c0_i32_0 : i32, i32, i32
  }
  func.func @transform_1(%arg0: i32) -> (i32, i32) {
    %c0_i32 = arith.constant 0 : i32
    %c0_i32_0 = arith.constant 0 : i32
    %c0_i32_1 = arith.constant 0 : i32
    return %c0_i32, %c0_i32_0 : i32, i32
  }
  func.func @transform_2(%arg0: i32) -> (i32, i32) {
    %c0_i32 = arith.constant 0 : i32
    %c0_i32_0 = arith.constant 0 : i32
    %c0_i32_1 = arith.constant 0 : i32
    return %c0_i32, %c0_i32_0 : i32, i32
  }
  func.func @transform_3(%arg0: i32) -> (i32, i32) {
    %c0_i32 = arith.constant 0 : i32
    %c0_i32_0 = arith.constant 0 : i32
    %c0_i32_1 = arith.constant 0 : i32
    return %c0_i32, %c0_i32_0 : i32, i32
  }
  func.func @transform_4(%arg0: i32) -> (i32, i32) {
    %c0_i32 = arith.constant 0 : i32
    %c0_i32_0 = arith.constant 0 : i32
    %c0_i32_1 = arith.constant 0 : i32
    return %c0_i32, %c0_i32_0 : i32, i32
  }
  func.func @transform_5(%arg0: i32) -> (i32, i32, i32) {
    %c0_i32 = arith.constant 0 : i32
    %c0_i32_0 = arith.constant 0 : i32
    %c0_i32_1 = arith.constant 0 : i32
    return %arg0, %c0_i32, %c0_i32_0 : i32, i32, i32
  }
}

</mosaic_0001>

<bundles_post_ra>
// kernel: tpu_custom_call.1
= control target key start
LH: loop header
LB: loop body
LE: loop exit
PB: predicated region body
PF: predicated region fallthrough
CT: control target
= control target key end

     0   :  { %10 = vsyncpa [#allocation3], 0  ;;  %s657_s0 = inlined_call_operand.vmem [shape: f32[2,4,16], index: 0, kind: input, shape index: {}]   ;;  %s658_s1 = inlined_call_operand.vmem [shape: f32[4,3], index: 1, kind: input, shape index: {}]   ;;  %s659_s2 = inlined_call_operand.vmem [shape: f32[4,1], index: 2, kind: input, shape index: {}]   ;;  %s660_s3 = inlined_call_operand.vmem [shape: f32[8,4], index: 3, kind: input, shape index: {}]   ;;  %s661_s4 = inlined_call_operand.vmem [shape: f32[8,1], index: 4, kind: input, shape index: {}]   ;;  %s662_s5 = inlined_call_operand.hbm [shape: f32[2,8,16], index: 5, kind: output, shape index: {}]  }
   0x1   :  { %12 = vsyncpa [#allocation3 + $0x1], 0  ;;  %s545_s18 = smov 0   ;;  %s547_s19 = smov 0  }
   0x2   :  { %s549_s20 = smov 0   ;;  %s551_s21 = smov 0  }
   0x3 LB: > { %s566_s22 = sadd.s32 4294967295, %s506_s21   ;;  %s381_s23 = sadd.s32 4294967294, %s506_s21   ;;  %s506_s21 = sphi %s551_s21, %s668_s21   ;;  %s502_s20 = sphi %s549_s20, %s667_s20   ;;  %s498_s19 = sphi %s547_s19, %s666_s19   ;;  %s494_s18 = sphi %s545_s18, %s665_s18  }
   0x4   : > { %s570_s24 = sadd.s32 1, %s506_s21   ;;  %s135_s25 = sadd.s32 1, %s502_s20 }
   0x5   : > { %s132_s26 = ssub.s32 %s506_s21, %s570_s24  ;;  %p145_p0 = scmp.ne.s32.totalorder %s502_s20, %s498_s19 }
   0x6   : > { %p133_p1 = scmp.eq.s32.totalorder %s132_s26, 0  ;;  %p146_p2 = scmp.eq.s32.totalorder %s566_s22, 1 }
   0x7   : > { %p151_p3 = scmp.ne.s32.totalorder %s498_s19, %s494_s18  ;;  %p152_p4 = scmp.eq.s32.totalorder %s381_s23, 1 }
   0x8   : > { %s581_s27 = scalar_select %p133_p1, %s502_s20, %s135_s25  }
   0x9   : > { %p583_p5 = por %p146_p2, %p145_p0  ;;  %p587_p6 = por %p152_p4, %p151_p3 }
   0xa   : > { %p384_p7 = scmp.ge.s32.totalorder %s506_s21, 1  ;;  %p189_p8 = scmp.lt.s32.totalorder %s506_s21, 3 }
   0xc   : > { %p190_p9 = pnand %p384_p7, %p189_p8 }
   0xd   : > { %v220_v0 = vld [vmem:[%s658_s1] sm:$0xf] (!%p190_p9)  ;;  %p216_p10 = scmp.lt.s32.totalorder (!%p190_p9), %s566_s22, 1  ;;  %v508_v1 = vmov (!%p190_p9), 2   ;;  %v509_v2 = vmov (!%p190_p9), 0   ;;  %v510_v3 = vmov (!%p190_p9), 1   ;;  %v260_v14 = vlaneseq (!%p190_p9) }
   0xe   : > { %193 = sbr.rel (%p190_p9) target bundleno = 189 (0xbd), region = 40  ;;  %438 = vset.pattern.permute.xlu1 (!%p190_p9), %v508_v1  ;;  %436 = vset.pattern.permute.xlu0 (!%p190_p9), %v509_v2  ;;  %s511_s12 = smov (!%p190_p9), 1   ;;  %v221_v5 = vld [vmem:[%s659_s2] sm:$0xf] (!%p190_p9)  ;;  %v513_v7 = vmov (!%p190_p9), 3   ;;  %vm229_vm0 = vcmask (!%p190_p9), 7168  }
   0xf   : > { %249 = vperm.xlu1 (!%p190_p9), %438, %v220_v0   ;;  %233 = vperm.xlu0 (!%p190_p9), %436, %v220_v0   ;;  %s512_s15 = smov (!%p190_p9), 127   ;;  %v222_v6 = vld [vmem:[%s660_s3] sm:$0xff] (!%p190_p9)  ;;  %vm246_vm1 = vcmask (!%p190_p9), 121856   ;;  %v261_v19 = vshrl.u32 (!%p190_p9), %v260_v14, 7  ;;  %s213_s26 = sand.u32 (!%p190_p9), 1, %s498_s19   ;;  %vm306_vm2 = vcmask (!%p190_p9), 130048  }
  0x10   : > { %v223_v8 = vld [vmem:[%s661_s4] sm:$0xff] (!%p190_p9)  ;;  %s385_s30 = sshll.u32 (!%p190_p9), %s213_s26, 3  ;;  %s388_s6 = sshll.u32 (!%p190_p9), %s566_s22, 7 }
  0x11   : > { %v272_v24 = vsub.s32 (!%p190_p9), 1, %v261_v19  ;;  %v262_v25 = vsub.s32 (!%p190_p9), 0, %v261_v19  ;;  %v282_v27 = vsub.s32 (!%p190_p9), 2, %v261_v19  ;;  %v292_v30 = vsub.s32 (!%p190_p9), 3, %v261_v19 }
  0x13   : > { %437 = vset.pattern.permute.xlu0 (!%p190_p9), %v510_v3  ;;  %439 = vset.pattern.permute.xlu1 (!%p190_p9), %v509_v2 }
  0x14   : > { %238 = vperm.xlu0 (!%p190_p9), %437, %v220_v0  }
  0x15   : > { %s217_s7 = scalar_select %p216_p10, %s566_s22, 1 }
  0x16   : > { %s514_s22 = smov [#allocation2]  }
  0x17   : > { %s386_s8 = sshll.u32 %s217_s7, 2  ;;  %s215_s7 = scalar_lea.vmem [#allocation2], %s385_s30 }
  0x18   : > { %s219_s11 = scalar_lea.vmem %s657_s0, %s386_s8  ;;  %s322_s8 = sshll.u32 %s215_s7, 4  ;;  %s617_s8 = int_to_ptr.vmem [resolvable:$true] %s322_s8 }
  0x19   : > { %v224_v4 = vld [vmem:[%s219_s11] sm:$0xf]  ;;  %s615_s11 = scalar_lea.hbm %s662_s5, %s388_s6  ;;  %s444_s13 = scalar_lea.vmem %s617_s8, 128 }
  0x1a   : > { %226 = vrot.lane.b32.xlu1 %v224_v4, %s511_s12  ;;  %243 = vrot.lane.b32.xlu0 %v224_v4, %s512_s15  ;;  %s309_s12 = scalar_lea.sflag [#allocation3], %s213_s26  ;;  %p445_p11 = scmp.ne.s32.totalorder %s617_s8, %s444_s13 }
  0x1b   : > { %s448_s14 = sshll.u32 %s514_s22, 4  ;;  %s449_s14 = int_to_ptr.vmem [resolvable:$false] %s448_s14 }
  0x1c   : > { %p446_p12 = pnand %p445_p11, %p583_p5  ;;  %s450_s15 = scalar_lea.vmem %s449_s14, 256 }
  0x1d   : > { %p451_p0 = scmp.lt.s32.totalorder %s617_s8, %s449_s14  ;;  %p452_p1 = scmp.lt.s32.totalorder %s450_s15, %s444_s13 }
  0x1e   : > { %256 = vperm.xlu1 %439, %v221_v5   ;;  %275 = vperm.xlu0 %437, %v222_v6   ;;  %p447_p13 = pneg %p446_p12 }
  0x1f   : > { %p453_p2 = por %p452_p1, %p451_p0 }
  0x21   : > { %p454_p3 = pnand %p453_p2, %p447_p13 }
  0x22   : > { %266 = vperm.xlu1 %439, %v222_v6   ;;  %441 = vset.pattern.permute.xlu0 %v513_v7 }
  0x23   : > { %295 = vperm.xlu0 %441, %v222_v6  }
  0x26   : > { %440 = vset.pattern.permute.xlu1 %v508_v1 }
  0x27   : > { %285 = vperm.xlu1 %440, %v222_v6   ;;  %443 = vset.pattern.permute.xlu0 %v509_v2 }
  0x2b   : > { %442 = vset.pattern.permute.xlu1 %v509_v2 }
  0x2c   : > { %302 = vperm.xlu1 %442, %v223_v8  }
  0x8e   : > { %v250_v9 = vpop.permute.xlu1 %249  ;;  %v234_v10 = vpop.permute.xlu0 %233 }
  0x92   : > { %v227_v11 = vpop.permute.xlu1 %226 }
  0x93   : > { %v230_v12 = vsel %vm229_vm0, 0.0, %v227_v11  ;;  %v239_v13 = vpop.permute.xlu0 %238 }
  0x94   : > { %v236_v15 = vmul.f32 %v234_v10, %v230_v12  ;;  %v241_v16 = vmul.f32 %v239_v13, %v224_v4 }
  0x96   : > { %v242_v21 = vadd.f32 %v241_v16, %v236_v15 }
  0x97   : > { %v244_v17 = vpop.permute.xlu0 %243 }
  0x98   : > { %v247_v20 = vsel %vm246_vm1, %v244_v17, 0.0 }
  0x99   : > { %v252_v22 = vmul.f32 %v250_v9, %v247_v20 }
  0x9b   : > { %v253_v23 = vadd.f32 %v252_v22, %v242_v21 }
  0x9d   : > { %v257_v18 = vpop.permute.xlu1 %256  ;;  %v276_v28 = vpop.permute.xlu0 %275 }
  0x9e   : > { %v259_v29 = vadd.f32 %v257_v18, %v253_v23 }
  0xa0   : > { %v273_v31 = vrot.slane %v259_v29, %v272_v24  ;;  %v263_v32 = vrot.slane %v259_v29, %v262_v25  ;;  %v283_v33 = vrot.slane %v259_v29, %v282_v27  ;;  %v293_v37 = vrot.slane %v259_v29, %v292_v30 }
  0xa1   : > { %v267_v26 = vpop.permute.xlu1 %266 }
  0xa2   : > { %v278_v35 = vmul.f32 %v276_v28, %v273_v31  ;;  %v269_v36 = vmul.f32 %v267_v26, %v263_v32  ;;  %v296_v38 = vpop.permute.xlu0 %295 }
  0xa3   : > { %v298_v41 = vmul.f32 %v296_v38, %v293_v37 }
  0xa4   : > { %v279_v39 = vadd.f32 %v278_v35, %v269_v36 }
  0xa6   : > { %v286_v34 = vpop.permute.xlu1 %285 }
  0xa7   : > { %v288_v40 = vmul.f32 %v286_v34, %v283_v33 }
  0xa9   : > { %v289_v42 = vadd.f32 %v288_v40, %v279_v39 }
  0xab   : > { %v303_v43 = vpop.permute.xlu1 %302  ;;  %v299_v44 = vadd.f32 %v298_v41, %v289_v42 }
  0xad   : > { %v305_v45 = vadd.f32 %v303_v43, %v299_v44 }
  0xaf   : > { %307 = vst.msk [vmem:[%s215_s7] sm:$0xff] %vm306_vm2, %v305_v45 }
  0xb0   : > { %457 = shalt.err (!%p454_p3)
}
  0xb1   : > { %s458_s16 = scalar_lea.hbm %s615_s11, 128  ;;  %s462_s25 = scalar_lea.hbm %s662_s5, 256 }
  0xb2   : > { %p459_p4 = scmp.ne.s32.totalorder %s615_s11, %s458_s16  ;;  %p463_p9 = scmp.lt.u32.totalorder %s615_s11, %s662_s5 }
  0xb3   : > { %p464_p10 = scmp.lt.u32.totalorder %s462_s25, %s458_s16  ;;  %p466_p12 = scmp.lt.u32.totalorder %s458_s16, %s615_s11 }
  0xb4   : > { %p460_p7 = pnand %p459_p4, %p583_p5 }
  0xb5   : > { %p465_p11 = por %p464_p10, %p463_p9 }
  0xb6   : > { %p461_p8 = pneg %p460_p7 }
  0xb7   : > { %p467_p13 = por %p466_p12, %p465_p11 }
  0xb9   : > { %p468_p0 = pnand %p467_p13, %p461_p8 }
  0xbb   : > { %471 = shalt.err (!%p468_p0)
}
  0xbc   : > { %391 = dma.vmem_to_hbm [thread:$0]  (%p583_p5), %s617_s8, 128, %s615_s11, %s309_s12  }
  0xbd PF: > { %p397_p1 = scmp.ge.s32.totalorder %s506_s21, 2  ;;  %s334_s6 = sand.u32 1, %s494_s18  }
  0xbe   : > { %s335_s7 = scalar_lea.sflag [#allocation3], %s334_s6 }
  0xbf   : > { %p394_p2 = pnand %p397_p1, %p587_p6 }
  0xc1   : > { %489 = dma.done.wait (!%p394_p2), %s335_s7, 128  }
  0xc2   : > { %491 = vsyncadd (!%p394_p2), %s335_s7, 4294967168  ;;  %p15_p3 = scmp.ge.s32.totalorder %s570_s24, 4   ;;  %s665_s18 = smov %s498_s19 }
  0xc3   : > { %s666_s19 = smov %s502_s20  ;;  %s667_s20 = smov %s581_s27 }
  0xc4   : > { %s668_s21 = smov %s570_s24  ;;  %17 = sbr.rel (!%p15_p3) target bundleno = 3 (0x3), region = 75 }
  0xcb   :  { %340 = vsyncpa [#allocation3], 1 }
  0xcc   :  { %342 = vsyncpa [#allocation3 + $0x1], 1 }

</bundles_post_ra>
